<compile_context>
chip_gen: v7x
topology: tpu7x:2x2x1
jax: 0.10.0
libtpu: 0.0.40
codegen_flags: <defaults>
</compile_context>

<pallas_src>
import functools

import jax
import jax.numpy as jnp
from jax.experimental import pallas as pl
from jax.experimental.pallas import tpu as pltpu

HIDDEN = 256
_LANE = 128  # TPU vreg lane width; batch tiles are multiples of this.


def _vnet_kernel(x_ref, w1_ref, b1_ref, w2_ref, b2_ref, w3_ref, b3_ref, o_ref):
    # Compute dtype is whatever the weights were cast to (f32 or bf16); the
    # input block is DMA'd as f32 and cast here, on data already in VMEM.
    cdt = w1_ref.dtype
    x = x_ref[...].astype(cdt)

    # h1 = relu(x @ W1 + b1)            (tile, 256)  -- MXU, f32 accumulation
    h1 = jnp.dot(x, w1_ref[...], preferred_element_type=jnp.float32)
    h1 = jnp.maximum(h1 + b1_ref[...], 0.0)

    # h2 = relu(h1 @ W2 + b2)           (tile, 256)  -- MXU, f32 accumulation
    h2 = jnp.dot(h1.astype(cdt), w2_ref[...], preferred_element_type=jnp.float32)
    h2 = jnp.maximum(h2 + b2_ref[...], 0.0)

    # layer3: (tile, 256) @ (256, 1) -> (tile, 1) in the MXU's native
    # orientation (contract h2's lane dim with w3's first dim): no XLU
    # transpose of the h2 tile, and the output maps straight onto (B, 1).
    out = jnp.dot(h2.astype(cdt), w3_ref[...], preferred_element_type=jnp.float32)
    o_ref[...] = (out + b3_ref[0]).astype(o_ref.dtype)


def _round_up(x, m):
    return ((x + m - 1) // m) * m


def _choose_batch_tile(batch, max_tile=2048):
    """Lane-aligned batch tile.

    Prefer exactly two grid steps of >=512 rows (engages both v7x TensorCores
    via CORE_PARALLEL without making steps overhead-dominated); otherwise one
    big step, capped at max_tile (VMEM-safe on every generation incl. v5e's
    16 MiB scoped default)."""
    if _round_up(batch, _LANE) > max_tile:
        return max_tile
    half = _round_up(-(-batch // 2), _LANE)
    if half >= 512:
        return half                      # exactly 2 grid steps
    return min(_round_up(max(batch, 1), _LANE), max_tile)   # 1 grid step


def _grid_semantics():
    # Only CORE_PARALLEL actually changes codegen (splits the batch grid across
    # TensorCores); v7x has 2 TCs/chip.  Use plain "parallel" on single-TC
    # chips (v5e/v6e) to stay conservative.
    try:
        kind = jax.devices()[0].device_kind.lower()
    except Exception:  # pragma: no cover - defensive
        kind = ""
    if "7" in kind:
        return (pltpu.CORE_PARALLEL,)
    return ("parallel",)


@functools.partial(jax.jit, static_argnames=("batch_tile", "compute_dtype"))
def vnetwork_forward(state, params, *, batch_tile=None,
                     compute_dtype=jnp.bfloat16):
    """Pallas forward for VNetwork.

    state:  (B, state_dim) float32
    params: dict with w1 (S,256), b1 (1,256), w2 (256,256), b2 (1,256),
            w3 (256,1), b3 (1,1)   (all float32)
    returns (B, 1) float32
    """
    B, S = state.shape
    if batch_tile is None:
        batch_tile = _choose_batch_tile(B)
    assert batch_tile % _LANE == 0, "batch_tile must be a multiple of 128"

    num_tiles = pl.cdiv(B, batch_tile)

    # Only the tiny, reused weights are cast in the wrapper; x stays f32 in HBM
    # (no extra full-array cast pass) and is cast inside the kernel.
    mm_dtype = jnp.dtype(compute_dtype)
    w1 = params["w1"].astype(mm_dtype)
    w2 = params["w2"].astype(mm_dtype)
    w3 = params["w3"].astype(mm_dtype)          # (256, 1) column
    b1 = params["b1"].reshape(1, HIDDEN)        # biases stay f32
    b2 = params["b2"].reshape(1, HIDDEN)
    b3 = params["b3"].reshape(1,)               # scalar, lives in SMEM

    itemsize = mm_dtype.itemsize
    flops = 2 * B * (S * HIDDEN + HIDDEN * HIDDEN + HIDDEN)
    bytes_accessed = (
        B * S * 4                                              # x in (f32)
        + (S * HIDDEN + HIDDEN * HIDDEN + HIDDEN) * itemsize   # weights
        + (2 * HIDDEN + 1) * 4                                 # biases
        + B * 4                                                # output
    )

    out = pl.pallas_call(
        _vnet_kernel,
        out_shape=jax.ShapeDtypeStruct((B, 1), jnp.float32),
        grid_spec=pl.GridSpec(
            grid=(num_tiles,),
            in_specs=[
                # per-step batch slice of the input (boundary block is clamped
                # by Pallas, so no host-side padding is needed)
                pl.BlockSpec((batch_tile, S), lambda i: (i, 0)),
                # weights / biases: full arrays, VMEM-resident across steps
                pl.BlockSpec((S, HIDDEN), lambda i: (0, 0)),
                pl.BlockSpec((1, HIDDEN), lambda i: (0, 0)),
                pl.BlockSpec((HIDDEN, HIDDEN), lambda i: (0, 0)),
                pl.BlockSpec((1, HIDDEN), lambda i: (0, 0)),
                pl.BlockSpec((HIDDEN, 1), lambda i: (0, 0)),
                # scalar output bias lives in SMEM (no (8,128) vreg padding)
                pl.BlockSpec(memory_space=pltpu.MemorySpace.SMEM),
            ],
            out_specs=pl.BlockSpec((batch_tile, 1), lambda i: (i, 0)),
        ),
        compiler_params=pltpu.CompilerParams(
            dimension_semantics=_grid_semantics(),
        ),
        cost_estimate=pl.CostEstimate(
            flops=flops, transcendentals=0, bytes_accessed=bytes_accessed),
    )(state, w1, b1, w2, b2, w3, b3)

    return out


def init_vnetwork_params(key, state_dim):
    """Deterministic init mimicking PyTorch nn.Linear defaults
    (uniform(-1/sqrt(fan_in), 1/sqrt(fan_in)) for both weight and bias)."""
    k1, k2, k3, k4, k5, k6 = jax.random.split(key, 6)

    def uniform(k, shape, fan_in):
        bound = 1.0 / jnp.sqrt(jnp.float32(fan_in))
        return jax.random.uniform(k, shape, jnp.float32, -bound, bound)

    return {
        "w1": uniform(k1, (state_dim, HIDDEN), state_dim),
        "b1": uniform(k2, (1, HIDDEN), state_dim),
        "w2": uniform(k3, (HIDDEN, HIDDEN), HIDDEN),
        "b2": uniform(k4, (1, HIDDEN), HIDDEN),
        "w3": uniform(k5, (HIDDEN, 1), HIDDEN),
        "b3": uniform(k6, (1, 1), HIDDEN),
    }


def vnetwork_reference(state, params):
    h1 = jax.nn.relu(state @ params["w1"] + params["b1"])
    h2 = jax.nn.relu(h1 @ params["w2"] + params["b2"])
    return h2 @ params["w3"] + params["b3"]


if __name__ == "__main__":
    key = jax.random.PRNGKey(0)
    k_params, k_state, k_state2 = jax.random.split(key, 3)

    # small shapes consistent with the module
    batch, state_dim = 8, 16
    params = init_vnetwork_params(k_params, state_dim)
    state = jax.random.normal(k_state, (batch, state_dim), jnp.float32)

    # 1) f32 compute path: bit-matches the reference (tight tolerance).
    out = jax.block_until_ready(
        vnetwork_forward(state, params, compute_dtype=jnp.float32))
    ref = vnetwork_reference(state, params)
    assert out.shape == (batch, 1), out.shape
    assert jnp.allclose(out, ref, atol=1e-4, rtol=1e-4), (
        float(jnp.max(jnp.abs(out - ref))))

    # 2) default bf16 MXU path on a ragged batch (single partial block,
    #    boundary clamping, no host-side padding).  Looser tolerance for bf16.
    batch2 = 300
    state2 = jax.random.normal(k_state2, (batch2, state_dim), jnp.float32)
    out2 = jax.block_until_ready(vnetwork_forward(state2, params))
    ref2 = vnetwork_reference(state2, params)
    assert out2.shape == (batch2, 1), out2.shape
    assert jnp.allclose(out2, ref2, atol=5e-2, rtol=5e-2), (
        float(jnp.max(jnp.abs(out2 - ref2))))

    # 3) f32 path with a forced multi-step grid (grid=3, last block partial):
    #    exercises weight residency across steps + partial output writeback.
    out3 = jax.block_until_ready(
        vnetwork_forward(state2, params, batch_tile=128,
                         compute_dtype=jnp.float32))
    assert out3.shape == (batch2, 1), out3.shape
    assert jnp.allclose(out3, ref2, atol=1e-4, rtol=1e-4), (
        float(jnp.max(jnp.abs(out3 - ref2))))

    print("KERNEL_OK")
</pallas_src>

<mosaic_0001>
module attributes {stable_mosaic.version = 11 : i64} {
  func.func @_vnet_kernel(%arg0: i32, %arg1: memref<128x16xf32, #tpu.memory_space<vmem>>, %arg2: memref<16x256xf32, #tpu.memory_space<vmem>>, %arg3: memref<1x256xf32, #tpu.memory_space<vmem>>, %arg4: memref<256x256xf32, #tpu.memory_space<vmem>>, %arg5: memref<1x256xf32, #tpu.memory_space<vmem>>, %arg6: memref<256x1xf32, #tpu.memory_space<vmem>>, %arg7: memref<1xf32, #tpu.memory_space<smem>>, %arg8: memref<128x1xf32, #tpu.memory_space<vmem>>) attributes {dimension_semantics = [#tpu.dimension_semantics<parallel>], iteration_bounds = array<i64: 1>, scalar_prefetch = 0 : i64, scratch_operands = 0 : i64, tpu.core_type = #tpu.core_type<tc>, window_params = [{transform_indices = @transform_0, window_bounds = array<i64: 128, 16>}, {pipeline_mode = #tpu.pipeline_mode<synchronous>, transform_indices = @transform_1, window_bounds = array<i64: 16, 256>}, {pipeline_mode = #tpu.pipeline_mode<synchronous>, transform_indices = @transform_2, window_bounds = array<i64: 1, 256>}, {pipeline_mode = #tpu.pipeline_mode<synchronous>, transform_indices = @transform_3, window_bounds = array<i64: 256, 256>}, {pipeline_mode = #tpu.pipeline_mode<synchronous>, transform_indices = @transform_4, window_bounds = array<i64: 1, 256>}, {pipeline_mode = #tpu.pipeline_mode<synchronous>, transform_indices = @transform_5, window_bounds = array<i64: 256, 1>}, {transform_indices = @transform_6, window_bounds = array<i64: 1>}, {transform_indices = @transform_7, window_bounds = array<i64: 128, 1>}]} {
    %c0 = arith.constant 0 : index
    %c0_0 = arith.constant 0 : index
    %0 = vector.load %arg1[%c0, %c0_0] : memref<128x16xf32, #tpu.memory_space<vmem>>, vector<128x16xf32>
    %c0_1 = arith.constant 0 : index
    %c0_2 = arith.constant 0 : index
    %1 = vector.load %arg2[%c0_1, %c0_2] : memref<16x256xf32, #tpu.memory_space<vmem>>, vector<16x256xf32>
    %cst = arith.constant dense<0.000000e+00> : vector<128x256xf32>
    %2 = tpu.matmul %0, %1, %cst {dimension_numbers = #tpu.dot_dimension_numbers<[1], [0], [0], [1], [0, 0, 1, 1], [], []>} : vector<128x16xf32>, vector<16x256xf32>, vector<128x256xf32> -> vector<128x256xf32>
    %c0_3 = arith.constant 0 : index
    %c0_4 = arith.constant 0 : index
    %3 = vector.load %arg3[%c0_3, %c0_4] : memref<1x256xf32, #tpu.memory_space<vmem>>, vector<1x256xf32>
    %4 = vector.broadcast %3 : vector<1x256xf32> to vector<128x256xf32>
    %5 = arith.addf %2, %4 : vector<128x256xf32>
    %cst_5 = arith.constant 0.000000e+00 : f32
    %6 = vector.broadcast %cst_5 : f32 to vector<128x256xf32>
    %7 = arith.maximumf %5, %6 : vector<128x256xf32>
    %c0_6 = arith.constant 0 : index
    %c0_7 = arith.constant 0 : index
    %8 = vector.load %arg4[%c0_6, %c0_7] : memref<256x256xf32, #tpu.memory_space<vmem>>, vector<256x256xf32>
    %cst_8 = arith.constant dense<0.000000e+00> : vector<128x256xf32>
    %9 = tpu.matmul %7, %8, %cst_8 {dimension_numbers = #tpu.dot_dimension_numbers<[1], [0], [0], [1], [0, 0, 1, 1], [], []>} : vector<128x256xf32>, vector<256x256xf32>, vector<128x256xf32> -> vector<128x256xf32>
    %c0_9 = arith.constant 0 : index
    %c0_10 = arith.constant 0 : index
    %10 = vector.load %arg5[%c0_9, %c0_10] : memref<1x256xf32, #tpu.memory_space<vmem>>, vector<1x256xf32>
    %11 = vector.broadcast %10 : vector<1x256xf32> to vector<128x256xf32>
    %12 = arith.addf %9, %11 : vector<128x256xf32>
    %cst_11 = arith.constant 0.000000e+00 : f32
    %13 = vector.broadcast %cst_11 : f32 to vector<128x256xf32>
    %14 = arith.maximumf %12, %13 : vector<128x256xf32>
    %c0_12 = arith.constant 0 : index
    %c0_13 = arith.constant 0 : index
    %15 = vector.load %arg6[%c0_12, %c0_13] : memref<256x1xf32, #tpu.memory_space<vmem>>, vector<256x1xf32>
    %cst_14 = arith.constant dense<0.000000e+00> : vector<128x1xf32>
    %16 = tpu.matmul %14, %15, %cst_14 {dimension_numbers = #tpu.dot_dimension_numbers<[1], [0], [0], [1], [0, 0, 1, 1], [], []>} : vector<128x256xf32>, vector<256x1xf32>, vector<128x1xf32> -> vector<128x1xf32>
    %c0_15 = arith.constant 0 : index
    %17 = memref.load %arg7[%c0_15] : memref<1xf32, #tpu.memory_space<smem>>
    %18 = vector.broadcast %17 : f32 to vector<128x1xf32>
    %19 = arith.addf %16, %18 : vector<128x1xf32>
    %c0_16 = arith.constant 0 : index
    %c0_17 = arith.constant 0 : index
    %20 = vector.load %arg8[%c0_16, %c0_17] : memref<128x1xf32, #tpu.memory_space<vmem>>, vector<128x1xf32>
    tpu.vector_store %arg8[%c0_16, %c0_17], %19 {strides = array<i32>} : memref<128x1xf32, #tpu.memory_space<vmem>>, vector<128x1xf32>,
    return
  }
  func.func @transform_0(%arg0: i32) -> (i32, i32) {
    %c0_i32 = arith.constant 0 : i32
    %c0_i32_0 = arith.constant 0 : i32
    return %arg0, %c0_i32 : i32, i32
  }
  func.func @transform_1(%arg0: i32) -> (i32, i32) {
    %c0_i32 = arith.constant 0 : i32
    %c0_i32_0 = arith.constant 0 : i32
    %c0_i32_1 = arith.constant 0 : i32
    return %c0_i32, %c0_i32_0 : i32, i32
  }
  func.func @transform_2(%arg0: i32) -> (i32, i32) {
    %c0_i32 = arith.constant 0 : i32
    %c0_i32_0 = arith.constant 0 : i32
    %c0_i32_1 = arith.constant 0 : i32
    return %c0_i32, %c0_i32_0 : i32, i32
  }
  func.func @transform_3(%arg0: i32) -> (i32, i32) {
    %c0_i32 = arith.constant 0 : i32
    %c0_i32_0 = arith.constant 0 : i32
    %c0_i32_1 = arith.constant 0 : i32
    return %c0_i32, %c0_i32_0 : i32, i32
  }
  func.func @transform_4(%arg0: i32) -> (i32, i32) {
    %c0_i32 = arith.constant 0 : i32
    %c0_i32_0 = arith.constant 0 : i32
    %c0_i32_1 = arith.constant 0 : i32
    return %c0_i32, %c0_i32_0 : i32, i32
  }
  func.func @transform_5(%arg0: i32) -> (i32, i32) {
    %c0_i32 = arith.constant 0 : i32
    %c0_i32_0 = arith.constant 0 : i32
    %c0_i32_1 = arith.constant 0 : i32
    return %c0_i32, %c0_i32_0 : i32, i32
  }
  func.func @transform_6(%arg0: i32) -> i32 {
    %c0_i32 = arith.constant 0 : i32
    %c0_i32_0 = arith.constant 0 : i32
    return %c0_i32 : i32
  }
  func.func @transform_7(%arg0: i32) -> (i32, i32) {
    %c0_i32 = arith.constant 0 : i32
    %c0_i32_0 = arith.constant 0 : i32
    return %arg0, %c0_i32 : i32, i32
  }
}

</mosaic_0001>

<bundles_post_ra>
// kernel: vnetwork_forward.1
= control target key start
LH: loop header
LB: loop body
LE: loop exit
PB: predicated region body
PF: predicated region fallthrough
CT: control target
= control target key end

     0   :  { %13 = vsyncpa [#allocation4], 0  ;;  %s1045_s24 = smov [#allocation3]   ;;  %s1385_s0 = inlined_call_operand.vmem [shape: f32[8,16], index: 0, kind: input, shape index: {}]   ;;  %s1386_s1 = inlined_call_operand.vmem [shape: f32[16,256], index: 1, kind: input, shape index: {}]   ;;  %s1387_s2 = inlined_call_operand.vmem [shape: f32[1,256], index: 2, kind: input, shape index: {}]   ;;  %s1388_s3 = inlined_call_operand.hbm [shape: f32[256,256], index: 3, kind: input, shape index: {}]   ;;  %s1389_s4 = inlined_call_operand.vmem [shape: f32[1,256], index: 4, kind: input, shape index: {}]   ;;  %s1390_s5 = inlined_call_operand.vmem [shape: f32[256,1], index: 5, kind: input, shape index: {}]   ;;  %s1391_s6 = inlined_call_operand.<no memory space> [shape: f32[1], index: 6, kind: input, shape index: {}]   ;;  %s1392_s7 = inlined_call_operand.vmem [shape: f32[8,1], index: 7, kind: output, shape index: {}]  }
   0x1   :  { %s25_s25 = sshll.u32 %s1045_s24, 4  ;;  %s1021_s28 = scalar_lea.hbm %s1388_s3, 8192  ;;  %s26_s25 = int_to_ptr.vmem [resolvable:$true] %s25_s25 }
   0x2   :  { %p1022_p0 = scmp.ne.s32.totalorder %s1388_s3, %s1021_s28  ;;  %p1025_p1 = scmp.lt.u32.totalorder %s1021_s28, %s1388_s3 }
   0x4   :  { %p1027_p2 = pnand %p1025_p1, %p1022_p0 }
   0x6   :  { %1030 = shalt.err (!%p1027_p2)
}
   0x7   :  { %s1031_s10 = scalar_lea.vmem %s26_s25, 8192  ;;  %p1036_p4 = scmp.lt.s32.totalorder %s26_s25, %s26_s25 }
   0x8   :  { %p1032_p3 = scmp.ne.s32.totalorder %s26_s25, %s1031_s10  ;;  %p1037_p5 = scmp.lt.s32.totalorder %s1031_s10, %s1031_s10 }
   0xa   :  { %p1038_p6 = por %p1037_p5, %p1036_p4 }
   0xc   :  { %p1039_p7 = pnand %p1038_p6, %p1032_p3 }
   0xe   :  { %1042 = shalt.err (!%p1039_p7)
}
   0xf   :  { %s1046_s11 = smov 256   ;;  %s1047_s12 = smov 16  }
  0x10   :  { %31 = dma.hbm_to_vmem [thread:$0]  %s1388_s3, 8192, %s26_s25, [#allocation4], %s1046_s11, %s1046_s11, %s1047_s12  }
  0x11   :  { %1043 = dma.done.wait [#allocation4], 8192  }
  0x12   :  { %1044 = vsyncadd [#allocation4], 4294959104  ;;  %v1048_v0 = vmov 0.0   ;;  %v58_v1 = vld [vmem:[%s1386_s1 + $0x8] sm:$0xff]  ;;  %v60_v2 = vld [vmem:[%s1386_s1 + $0x18] sm:$0xff]  ;;  %vm73_vm0 = vcmask 130048  }
  0x13   :  { %186 = vmatprep.mubr.f32.mxu0 %v1048_v0  ;;  %v57_v3 = vld [vmem:[%s1386_s1] sm:$0xff]  ;;  %v917_v4 = vpack.c.bf16 %v60_v2, %v58_v1  ;;  %v59_v5 = vld [vmem:[%s1386_s1 + $0x10] sm:$0xff]  ;;  %v42_v8 = vld [vmem:[%s1385_s0 + $0x8] sm:$0xff]  ;;  %vm763_vm1 = vcmask 7168  }
  0x14   :  { %v919_v6 = vpack.c.bf16 %v59_v5, %v57_v3  ;;  %v41_v7 = vld [vmem:[%s1385_s0] sm:$0xff]  ;;  %v316_v9 = vld [vmem:[#allocation3 + $0x8] sm:$0xff]  ;;  %v318_v10 = vld [vmem:[#allocation3 + $0x18] sm:$0xff] }
  0x15   :  { %918 = vmatprep.subr.bf16.mxu0 %v917_v4  ;;  %v315_v11 = vld [vmem:[#allocation3] sm:$0xff]  ;;  %v317_v12 = vld [vmem:[#allocation3 + $0x10] sm:$0xff]  ;;  %v921_v13 = vpack.c.bf16 %v318_v10, %v316_v9  ;;  %v320_v15 = vld [vmem:[#allocation3 + $0x28] sm:$0xff] }
  0x16   :  { %920 = vmatpush1.bf16.msra.mxu0 %v919_v6  ;;  %v923_v14 = vpack.c.bf16 %v317_v12, %v315_v11  ;;  %v322_v16 = vld [vmem:[#allocation3 + $0x38] sm:$0xff]  ;;  %v319_v17 = vld [vmem:[#allocation3 + $0x20] sm:$0xff]  ;;  %v321_v19 = vld [vmem:[#allocation3 + $0x30] sm:$0xff] }
  0x17   :  { %v925_v18 = vpack.c.bf16 %v322_v16, %v320_v15  ;;  %v324_v20 = vld [vmem:[#allocation3 + $0x48] sm:$0xff]  ;;  %v326_v21 = vld [vmem:[#allocation3 + $0x58] sm:$0xff]  ;;  %922 = vmatprep.subr.bf16.mxu1 %v921_v13  ;;  %v927_v22 = vpack.c.bf16 %v321_v19, %v319_v17  ;;  %v43_v23 = vld [vmem:[%s1385_s0 + $0x10] sm:$0xff] }
  0x18   :  { %924 = vmatpush1.bf16.msra.mxu1 %v923_v14  ;;  %v929_v24 = vpack.c.bf16 %v326_v21, %v324_v20  ;;  %v323_v25 = vld [vmem:[#allocation3 + $0x40] sm:$0xff]  ;;  %v325_v26 = vld [vmem:[#allocation3 + $0x50] sm:$0xff]  ;;  %v328_v27 = vld [vmem:[#allocation3 + $0x68] sm:$0xff] }
  0x19   :  { %821 = vmatmul.mubr.msk.f32.vlgmr.msra.gmra.mrb[0].mxu0 %vm73_vm0, %v41_v7  ;;  %926 = vmatprep.subr.bf16.mxu1 %v925_v18  ;;  %v330_v28 = vld [vmem:[#allocation3 + $0x78] sm:$0xff]  ;;  %v931_v29 = vpack.c.bf16 %v325_v26, %v323_v25  ;;  %v327_v32 = vld [vmem:[#allocation3 + $0x60] sm:$0xff]  ;;  %v329_v33 = vld [vmem:[#allocation3 + $0x70] sm:$0xff] }
  0x1a   :  { %192 = vmatprep.mubr.f32.mxu0 %v1048_v0  ;;  %v44_v30 = vld [vmem:[%s1385_s0 + $0x18] sm:$0xff]  ;;  %v933_v31 = vpack.c.bf16 %v330_v28, %v328_v27  ;;  %v332_v34 = vld [vmem:[#allocation3 + $0x88] sm:$0xff]  ;;  %v935_v36 = vpack.c.bf16 %v329_v33, %v327_v32  ;;  %v45_v37 = vld [vmem:[%s1385_s0 + $0x20] sm:$0xff] }
  0x1b   :  { %v334_v35 = vld [vmem:[#allocation3 + $0x98] sm:$0xff]  ;;  %v331_v39 = vld [vmem:[#allocation3 + $0x80] sm:$0xff]  ;;  %v333_v40 = vld [vmem:[#allocation3 + $0x90] sm:$0xff] }
  0x1c   :  { %928 = vmatpush1.bf16.msra.mxu1 %v927_v22  ;;  %v937_v38 = vpack.c.bf16 %v334_v35, %v332_v34  ;;  %v336_v41 = vld [vmem:[#allocation3 + $0xa8] sm:$0xff]  ;;  %v338_v42 = vld [vmem:[#allocation3 + $0xb8] sm:$0xff]  ;;  %v939_v43 = vpack.c.bf16 %v333_v40, %v331_v39  ;;  %v335_v46 = vld [vmem:[#allocation3 + $0xa0] sm:$0xff] }
  0x1d   :  { %822 = vmatmul.mubr.msk.f32.gmra.mrb[2].mxu0 %vm73_vm0, %v42_v8  ;;  %930 = vmatprep.subr.bf16.mxu1 %v929_v24  ;;  %v46_v44 = vld [vmem:[%s1385_s0 + $0x28] sm:$0xff]  ;;  %v941_v45 = vpack.c.bf16 %v338_v42, %v336_v41  ;;  %v337_v47 = vld [vmem:[#allocation3 + $0xb0] sm:$0xff]  ;;  %v342_v49 = vld [vmem:[#allocation3 + $0xd8] sm:$0xff] }
  0x1e   :  { %198 = vmatprep.mubr.f32.mxu0 %v1048_v0  ;;  %v340_v48 = vld [vmem:[#allocation3 + $0xc8] sm:$0xff]  ;;  %v943_v50 = vpack.c.bf16 %v337_v47, %v335_v46  ;;  %v47_v51 = vld [vmem:[%s1385_s0 + $0x30] sm:$0xff]  ;;  %v339_v53 = vld [vmem:[#allocation3 + $0xc0] sm:$0xff] }
  0x1f   :  { %v945_v52 = vpack.c.bf16 %v342_v49, %v340_v48  ;;  %v341_v54 = vld [vmem:[#allocation3 + $0xd0] sm:$0xff]  ;;  %v344_v55 = vld [vmem:[#allocation3 + $0xe8] sm:$0xff]  ;;  %v346_v56 = vld [vmem:[#allocation3 + $0xf8] sm:$0xff] }
  0x20   :  { %932 = vmatpush1.bf16.msra.mxu1 %v931_v29  ;;  %v947_v57 = vpack.c.bf16 %v341_v54, %v339_v53  ;;  %v48_v58 = vld [vmem:[%s1385_s0 + $0x38] sm:$0xff]  ;;  %v949_v59 = vpack.c.bf16 %v346_v56, %v344_v55  ;;  %v343_v60 = vld [vmem:[#allocation3 + $0xe0] sm:$0xff]  ;;  %v345_v61 = vld [vmem:[#allocation3 + $0xf0] sm:$0xff] }
  0x21   :  { %823 = vmatmul.mubr.msk.f32.gmra.mrb[4].mxu0 %vm73_vm0, %v43_v23  ;;  %934 = vmatprep.subr.bf16.mxu1 %v933_v31  ;;  %v348_v62 = vld [vmem:[#allocation3 + $0x108] sm:$0xff]  ;;  %v350_v63 = vld [vmem:[#allocation3 + $0x118] sm:$0xff]  ;;  %v951_v1 = vpack.c.bf16 %v345_v61, %v343_v60  ;;  %v49_v2 = vld [vmem:[%s1385_s0 + $0x40] sm:$0xff] }
  0x22   :  { %204 = vmatprep.mubr.f32.mxu0 %v1048_v0  ;;  %v953_v3 = vpack.c.bf16 %v350_v63, %v348_v62  ;;  %v347_v4 = vld [vmem:[#allocation3 + $0x100] sm:$0xff]  ;;  %v349_v5 = vld [vmem:[#allocation3 + $0x110] sm:$0xff]  ;;  %v352_v6 = vld [vmem:[#allocation3 + $0x128] sm:$0xff] }
  0x23   :  { %v354_v7 = vld [vmem:[#allocation3 + $0x138] sm:$0xff]  ;;  %v955_v8 = vpack.c.bf16 %v349_v5, %v347_v4  ;;  %v50_v9 = vld [vmem:[%s1385_s0 + $0x48] sm:$0xff]  ;;  %v351_v11 = vld [vmem:[#allocation3 + $0x120] sm:$0xff] }
  0x24   :  { %936 = vmatpush1.bf16.msra.mxu1 %v935_v36  ;;  %v957_v10 = vpack.c.bf16 %v354_v7, %v352_v6  ;;  %v353_v12 = vld [vmem:[#allocation3 + $0x130] sm:$0xff]  ;;  %v356_v13 = vld [vmem:[#allocation3 + $0x148] sm:$0xff]  ;;  %v358_v14 = vld [vmem:[#allocation3 + $0x158] sm:$0xff] }
  0x25   :  { %824 = vmatmul.mubr.msk.f32.gmra.mrb[6].mxu0 %vm73_vm0, %v44_v30  ;;  %938 = vmatprep.subr.bf16.mxu1 %v937_v38  ;;  %v959_v15 = vpack.c.bf16 %v353_v12, %v351_v11  ;;  %v51_v16 = vld [vmem:[%s1385_s0 + $0x50] sm:$0xff]  ;;  %v961_v17 = vpack.c.bf16 %v358_v14, %v356_v13  ;;  %v355_v18 = vld [vmem:[#allocation3 + $0x140] sm:$0xff]  ;;  %v360_v20 = vld [vmem:[#allocation3 + $0x168] sm:$0xff] }
  0x26   :  { %210 = vmatprep.mubr.f32.mxu0 %v1048_v0  ;;  %v357_v19 = vld [vmem:[#allocation3 + $0x150] sm:$0xff]  ;;  %v362_v21 = vld [vmem:[#allocation3 + $0x178] sm:$0xff]  ;;  %v359_v25 = vld [vmem:[#allocation3 + $0x160] sm:$0xff] }
  0x27   :  { %v963_v22 = vpack.c.bf16 %v357_v19, %v355_v18  ;;  %v52_v23 = vld [vmem:[%s1385_s0 + $0x58] sm:$0xff]  ;;  %v965_v24 = vpack.c.bf16 %v362_v21, %v360_v20  ;;  %v361_v26 = vld [vmem:[#allocation3 + $0x170] sm:$0xff]  ;;  %v364_v27 = vld [vmem:[#allocation3 + $0x188] sm:$0xff] }
  0x28   :  { %940 = vmatpush1.bf16.msra.mxu1 %v939_v43  ;;  %v366_v28 = vld [vmem:[#allocation3 + $0x198] sm:$0xff]  ;;  %v967_v29 = vpack.c.bf16 %v361_v26, %v359_v25  ;;  %v53_v30 = vld [vmem:[%s1385_s0 + $0x60] sm:$0xff]  ;;  %v365_v33 = vld [vmem:[#allocation3 + $0x190] sm:$0xff] }
  0x29   :  { %825 = vmatmul.mubr.msk.f32.gmra.mrb[8].mxu0 %vm73_vm0, %v45_v37  ;;  %942 = vmatprep.subr.bf16.mxu1 %v941_v45  ;;  %v969_v31 = vpack.c.bf16 %v366_v28, %v364_v27  ;;  %v363_v32 = vld [vmem:[#allocation3 + $0x180] sm:$0xff]  ;;  %v368_v34 = vld [vmem:[#allocation3 + $0x1a8] sm:$0xff]  ;;  %v370_v35 = vld [vmem:[#allocation3 + $0x1b8] sm:$0xff] }
  0x2a   :  { %216 = vmatprep.mubr.f32.mxu0 %v1048_v0  ;;  %v971_v36 = vpack.c.bf16 %v365_v33, %v363_v32  ;;  %v54_v37 = vld [vmem:[%s1385_s0 + $0x68] sm:$0xff]  ;;  %v973_v38 = vpack.c.bf16 %v370_v35, %v368_v34  ;;  %v367_v39 = vld [vmem:[#allocation3 + $0x1a0] sm:$0xff]  ;;  %v369_v40 = vld [vmem:[#allocation3 + $0x1b0] sm:$0xff] }
  0x2b   :  { %v372_v41 = vld [vmem:[#allocation3 + $0x1c8] sm:$0xff]  ;;  %v374_v42 = vld [vmem:[#allocation3 + $0x1d8] sm:$0xff]  ;;  %v975_v43 = vpack.c.bf16 %v369_v40, %v367_v39  ;;  %v371_v47 = vld [vmem:[#allocation3 + $0x1c0] sm:$0xff]  ;;  %v63_v40 = vlaneseq }
  0x2c   :  { %944 = vmatpush1.bf16.msra.mxu1 %v943_v50  ;;  %v977_v45 = vpack.c.bf16 %v374_v42, %v372_v41  ;;  %v56_v46 = vld [vmem:[%s1385_s0 + $0x78] sm:$0xff]  ;;  %v373_v48 = vld [vmem:[#allocation3 + $0x1d0] sm:$0xff]  ;;  %v376_v50 = vld [vmem:[#allocation3 + $0x1e8] sm:$0xff] }
  0x2d   :  { %826 = vmatmul.mubr.msk.f32.gmra.mrb[10].mxu0 %vm73_vm0, %v46_v44  ;;  %946 = vmatprep.subr.bf16.mxu1 %v945_v52  ;;  %v55_v44 = vld [vmem:[%s1385_s0 + $0x70] sm:$0xff]  ;;  %v979_v49 = vpack.c.bf16 %v373_v48, %v371_v47  ;;  %v375_v53 = vld [vmem:[#allocation3 + $0x1e0] sm:$0xff]  ;;  %v601_v56 = vld [vmem:[%s1390_s5 + $0x88] sm:$0xff]  ;;  %v1289_v41 = vshrl.u32 %v63_v40, 7 }
  0x2e   :  { %222 = vmatprep.mubr.f32.mxu0 %v1048_v0  ;;  %v377_v54 = vld [vmem:[#allocation3 + $0x1f0] sm:$0xff]  ;;  %v603_v61 = vld [vmem:[%s1390_s5 + $0x98] sm:$0xff]  ;;  %v605_v4 = vld [vmem:[%s1390_s5 + $0xa8] sm:$0xff] }
  0x2f   :  { %v983_v55 = vpack.c.bf16 %v377_v54, %v375_v53  ;;  %v602_v60 = vld [vmem:[%s1390_s5 + $0x90] sm:$0xff]  ;;  %v588_v7 = vld [vmem:[%s1390_s5 + $0x20] sm:$0xff]  ;;  %v591_v14 = vld [vmem:[%s1390_s5 + $0x38] sm:$0xff]  ;;  %v65_v42 = vsub.s32 0, %v1289_v41 }
  0x30   :  { %948 = vmatpush1.bf16.msra.mxu1 %v947_v57  ;;  %v584_v57 = vld [vmem:[%s1390_s5] sm:$0xff]  ;;  %v989_v63 = vpack.c.bf16 %v603_v61, %v602_v60  ;;  %v590_v13 = vld [vmem:[%s1390_s5 + $0x30] sm:$0xff]  ;;  %v593_v20 = vld [vmem:[%s1390_s5 + $0x48] sm:$0xff] }
  0x31   :  { %827 = vmatmul.mubr.msk.f32.gmra.mrb[12].mxu0 %vm73_vm0, %v47_v51  ;;  %950 = vmatprep.subr.bf16.mxu1 %v949_v59  ;;  %v378_v51 = vld [vmem:[#allocation3 + $0x1f8] sm:$0xff]  ;;  %v585_v59 = vld [vmem:[%s1390_s5 + $0x8] sm:$0xff]  ;;  %v592_v19 = vld [vmem:[%s1390_s5 + $0x40] sm:$0xff] }
  0x32   :  { %228 = vmatprep.mubr.f32.mxu0 %v1048_v0  ;;  %v981_v52 = vpack.c.bf16 %v378_v51, %v376_v50  ;;  %v987_v62 = vpack.c.bf16 %v585_v59, %v584_v57  ;;  %v610_v21 = vld [vmem:[%s1390_s5 + $0xd0] sm:$0xff]  ;;  %v595_v26 = vld [vmem:[%s1390_s5 + $0x58] sm:$0xff]  ;;  %v612_v27 = vld [vmem:[%s1390_s5 + $0xe0] sm:$0xff] }
  0x33   :  { %v594_v25 = vld [vmem:[%s1390_s5 + $0x50] sm:$0xff]  ;;  %v613_v28 = vld [vmem:[%s1390_s5 + $0xe8] sm:$0xff]  ;;  %v615_v34 = vld [vmem:[%s1390_s5 + $0xf8] sm:$0xff] }
  0x34   :  { %952 = vmatpush1.bf16.msra.mxu1 %v951_v1  ;;  %v586_v1 = vld [vmem:[%s1390_s5 + $0x10] sm:$0xff]  ;;  %v597_v32 = vld [vmem:[%s1390_s5 + $0x68] sm:$0xff] }
  0x35   :  { %828 = vmatmul.mubr.msk.f32.gmra.mrb[14].mxu0 %vm73_vm0, %v48_v58  ;;  %954 = vmatprep.subr.bf16.mxu1 %v953_v3  ;;  %v604_v3 = vld [vmem:[%s1390_s5 + $0xa0] sm:$0xff]  ;;  %v614_v33 = vld [vmem:[%s1390_s5 + $0xf0] sm:$0xff] }
  0x36   :  { %234 = vmatprep.mubr.f32.mxu0 %v1048_v0  ;;  %v993_v6 = vpack.c.bf16 %v605_v4, %v604_v3 }
  0x38   :  { %956 = vmatpush1.bf16.msra.mxu1 %v955_v8  ;;  %v589_v8 = vld [vmem:[%s1390_s5 + $0x28] sm:$0xff] }
  0x39   :  { %829 = vmatmul.mubr.msk.f32.gmra.mrb[16].mxu0 %vm73_vm0, %v49_v2  ;;  %958 = vmatprep.subr.bf16.mxu1 %v957_v10  ;;  %v587_v2 = vld [vmem:[%s1390_s5 + $0x18] sm:$0xff]  ;;  %v995_v11 = vpack.c.bf16 %v589_v8, %v588_v7 }
  0x3a   :  { %240 = vmatprep.mubr.f32.mxu0 %v1048_v0  ;;  %v991_v5 = vpack.c.bf16 %v587_v2, %v586_v1  ;;  %v607_v10 = vld [vmem:[%s1390_s5 + $0xb8] sm:$0xff] }
  0x3c   :  { %960 = vmatpush1.bf16.msra.mxu1 %v959_v15  ;;  %v608_v15 = vld [vmem:[%s1390_s5 + $0xc0] sm:$0xff] }
  0x3d   :  { %830 = vmatmul.mubr.msk.f32.gmra.mrb[18].mxu0 %vm73_vm0, %v50_v9  ;;  %962 = vmatprep.subr.bf16.mxu1 %v961_v17  ;;  %v606_v9 = vld [vmem:[%s1390_s5 + $0xb0] sm:$0xff]  ;;  %v999_v17 = vpack.c.bf16 %v591_v14, %v590_v13 }
  0x3e   :  { %246 = vmatprep.mubr.f32.mxu0 %v1048_v0  ;;  %v997_v12 = vpack.c.bf16 %v607_v10, %v606_v9 }
  0x40   :  { %964 = vmatpush1.bf16.msra.mxu1 %v963_v22  ;;  %v611_v22 = vld [vmem:[%s1390_s5 + $0xd8] sm:$0xff] }
  0x41   :  { %831 = vmatmul.mubr.msk.f32.gmra.mrb[20].mxu0 %vm73_vm0, %v51_v16  ;;  %966 = vmatprep.subr.bf16.mxu1 %v965_v24  ;;  %v609_v16 = vld [vmem:[%s1390_s5 + $0xc8] sm:$0xff]  ;;  %v1005_v24 = vpack.c.bf16 %v611_v22, %v610_v21 }
  0x42   :  { %252 = vmatprep.mubr.f32.mxu0 %v1048_v0  ;;  %v1001_v18 = vpack.c.bf16 %v609_v16, %v608_v15 }
  0x44   :  { %968 = vmatpush1.bf16.msra.mxu1 %v967_v29  ;;  %v1007_v29 = vpack.c.bf16 %v595_v26, %v594_v25 }
  0x45   :  { %832 = vmatmul.mubr.msk.f32.gmra.mrb[22].mxu0 %vm73_vm0, %v52_v23  ;;  %970 = vmatprep.subr.bf16.mxu1 %v969_v31  ;;  %v1003_v23 = vpack.c.bf16 %v593_v20, %v592_v19  ;;  %v596_v31 = vld [vmem:[%s1390_s5 + $0x60] sm:$0xff] }
  0x46   :  { %258 = vmatprep.mubr.f32.mxu0 %v1048_v0  ;;  %v1011_v35 = vpack.c.bf16 %v597_v32, %v596_v31 }
  0x48   :  { %972 = vmatpush1.bf16.msra.mxu1 %v971_v36  ;;  %v1013_v36 = vpack.c.bf16 %v615_v34, %v614_v33 }
  0x49   :  { %833 = vmatmul.mubr.msk.f32.gmra.mrb[24].mxu0 %vm73_vm0, %v53_v30  ;;  %974 = vmatprep.subr.bf16.mxu1 %v973_v38  ;;  %v1009_v30 = vpack.c.bf16 %v613_v28, %v612_v27  ;;  %v599_v38 = vld [vmem:[%s1390_s5 + $0x78] sm:$0xff] }
  0x4a   :  { %264 = vmatprep.mubr.f32.mxu0 %v1048_v0 }
  0x4c   :  { %976 = vmatpush1.bf16.msra.mxu1 %v975_v43  ;;  %v61_v43 = vld [vmem:[%s1387_s2] sm:$0x3] }
  0x4d   :  { %834 = vmatmul.mubr.msk.f32.gmra.mrb[26].mxu0 %vm73_vm0, %v54_v37  ;;  %978 = vmatprep.subr.bf16.mxu1 %v977_v45  ;;  %v598_v37 = vld [vmem:[%s1390_s5 + $0x70] sm:$0xff]  ;;  %v1298_v45 = vrot.slane %v61_v43, %v65_v42 }
  0x4e   :  { %270 = vmatprep.mubr.f32.mxu0 %v1048_v0  ;;  %v1015_v39 = vpack.c.bf16 %v599_v38, %v598_v37 }
  0x50   :  { %980 = vmatpush1.bf16.msra.mxu1 %v979_v49 }
  0x51   :  { %835 = vmatmul.mubr.msk.f32.gmra.mrb[28].mxu0 %vm73_vm0, %v55_v44  ;;  %982 = vmatprep.subr.bf16.mxu1 %v981_v52  ;;  %v69_v44 = vsub.s32 1, %v1289_v41 }
  0x52   :  { %276 = vmatprep.mubr.f32.mxu0 %v1048_v0  ;;  %v600_v0 = vld [vmem:[%s1390_s5 + $0x80] sm:$0xff] }
  0x53   :  { %v985_v58 = vpack.c.bf16 %v601_v56, %v600_v0 }
  0x54   :  { %984 = vmatpush1.bf16.msra.mxu1 %v983_v55 }
  0x55   :  { %836 = vmatmul.mubr.msk.f32.gmra.mrb[30].mxu0 %vm73_vm0, %v56_v46  ;;  %986 = vmatprep.subr.bf16.mxu0 %v985_v58  ;;  %v1302_v46 = vrot.slane %v61_v43, %v69_v44 }
  0x56   :  { %988 = vmatpush3.bf16.msra.mxu0 %v987_v62 }
  0x57   :  { %990 = vmatprep.subr.bf16.mxu0 %v989_v63 }
  0x5a   :  { %992 = vmatpush3.bf16.msra.mxu0 %v991_v5 }
  0x5b   :  { %994 = vmatprep.subr.bf16.mxu0 %v993_v6 }
  0x5e   :  { %996 = vmatpush3.bf16.msra.mxu0 %v995_v11 }
  0x5f   :  { %998 = vmatprep.subr.bf16.mxu0 %v997_v12 }
  0x62   :  { %1000 = vmatpush3.bf16.msra.mxu0 %v999_v17 }
  0x63   :  { %1002 = vmatprep.subr.bf16.mxu0 %v1001_v18 }
  0x66   :  { %1004 = vmatpush3.bf16.msra.mxu0 %v1003_v23 }
  0x67   :  { %1006 = vmatprep.subr.bf16.mxu0 %v1005_v24 }
  0x6a   :  { %1008 = vmatpush3.bf16.msra.mxu0 %v1007_v29 }
  0x6b   :  { %1010 = vmatprep.subr.bf16.mxu0 %v1009_v30 }
  0x6e   :  { %1012 = vmatpush3.bf16.msra.mxu0 %v1011_v35 }
  0x6f   :  { %1014 = vmatprep.subr.bf16.mxu0 %v1013_v36 }
  0x72   :  { %1016 = vmatpush3.bf16.msra.mxu0 %v1015_v39 }
  0xec   :  { %v188_v47 = vpop.f32.mrb[0].mxu0 }
  0xed   :  { %v189_v48 = vadd.f32 %v188_v47, %v1298_v45  ;;  %v190_v49 = vpop.f32.mrb[1].mxu0 }
  0xee   :  { %v191_v50 = vadd.f32 %v190_v49, %v1302_v46 }
  0xef   :  { %v283_v53 = vmax.f32 %v189_v48, 0.0 }
  0xf0   :  { %v194_v51 = vpop.f32.mrb[2].mxu0  ;;  %v284_v52 = vmax.f32 %v191_v50, 0.0 }
  0xf1   :  { %v195_v54 = vadd.f32 %v194_v51, %v1298_v45  ;;  %v196_v55 = vpop.f32.mrb[3].mxu0 }
  0xf2   :  { %v197_v0 = vadd.f32 %v196_v55, %v1302_v46  ;;  %455 = vmatprep.mubr.f32.mxu1 %v284_v52 }
  0xf3   :  { %456 = vmatmul.mubr.f32.vlgmr.msra.gmra.mrb[0].mxu1 %v283_v53  ;;  %v285_v58 = vmax.f32 %v195_v54, 0.0 }
  0xf4   :  { %v286_v56 = vmax.f32 %v197_v0, 0.0  ;;  %v200_v57 = vpop.f32.mrb[4].mxu0 }
  0xf5   :  { %v201_v59 = vadd.f32 %v200_v57, %v1298_v45  ;;  %v202_v60 = vpop.f32.mrb[5].mxu0 }
  0xf6   :  { %v203_v61 = vadd.f32 %v202_v60, %v1302_v46  ;;  %461 = vmatprep.mubr.f32.mxu1 %v286_v56 }
  0xf7   :  { %462 = vmatmul.mubr.f32.gmra.mrb[2].mxu1 %v285_v58  ;;  %v287_v1 = vmax.f32 %v201_v59, 0.0 }
  0xf8   :  { %v288_v62 = vmax.f32 %v203_v61, 0.0  ;;  %v206_v63 = vpop.f32.mrb[6].mxu0 }
  0xf9   :  { %v207_v2 = vadd.f32 %v206_v63, %v1298_v45  ;;  %v208_v3 = vpop.f32.mrb[7].mxu0 }
  0xfa   :  { %v209_v4 = vadd.f32 %v208_v3, %v1302_v46  ;;  %467 = vmatprep.mubr.f32.mxu1 %v288_v62 }
  0xfb   :  { %468 = vmatmul.mubr.f32.gmra.mrb[4].mxu1 %v287_v1  ;;  %v289_v7 = vmax.f32 %v207_v2, 0.0 }
  0xfc   :  { %v290_v5 = vmax.f32 %v209_v4, 0.0  ;;  %v212_v6 = vpop.f32.mrb[8].mxu0 }
  0xfd   :  { %v213_v8 = vadd.f32 %v212_v6, %v1298_v45  ;;  %v214_v9 = vpop.f32.mrb[9].mxu0 }
  0xfe   :  { %v215_v10 = vadd.f32 %v214_v9, %v1302_v46  ;;  %473 = vmatprep.mubr.f32.mxu1 %v290_v5 }
  0xff   :  { %474 = vmatmul.mubr.f32.gmra.mrb[6].mxu1 %v289_v7  ;;  %v291_v13 = vmax.f32 %v213_v8, 0.0 }
 0x100   :  { %v292_v11 = vmax.f32 %v215_v10, 0.0  ;;  %v218_v12 = vpop.f32.mrb[10].mxu0 }
 0x101   :  { %v219_v14 = vadd.f32 %v218_v12, %v1298_v45  ;;  %v220_v15 = vpop.f32.mrb[11].mxu0 }
 0x102   :  { %v221_v16 = vadd.f32 %v220_v15, %v1302_v46  ;;  %479 = vmatprep.mubr.f32.mxu1 %v292_v11 }
 0x103   :  { %480 = vmatmul.mubr.f32.gmra.mrb[8].mxu1 %v291_v13  ;;  %v293_v19 = vmax.f32 %v219_v14, 0.0 }
 0x104   :  { %v294_v17 = vmax.f32 %v221_v16, 0.0  ;;  %v224_v18 = vpop.f32.mrb[12].mxu0 }
 0x105   :  { %v225_v20 = vadd.f32 %v224_v18, %v1298_v45  ;;  %v226_v21 = vpop.f32.mrb[13].mxu0 }
 0x106   :  { %v227_v22 = vadd.f32 %v226_v21, %v1302_v46  ;;  %485 = vmatprep.mubr.f32.mxu1 %v294_v17 }
 0x107   :  { %486 = vmatmul.mubr.f32.gmra.mrb[10].mxu1 %v293_v19  ;;  %v295_v25 = vmax.f32 %v225_v20, 0.0  ;;  %v379_v20 = vld [vmem:[%s1389_s4] sm:$0x3] }
 0x108   :  { %v296_v23 = vmax.f32 %v227_v22, 0.0  ;;  %v230_v24 = vpop.f32.mrb[14].mxu0  ;;  %v1341_v21 = vrot.slane %v379_v20, %v65_v42 }
 0x109   :  { %v231_v26 = vadd.f32 %v230_v24, %v1298_v45  ;;  %v232_v27 = vpop.f32.mrb[15].mxu0 }
 0x10a   :  { %v233_v28 = vadd.f32 %v232_v27, %v1302_v46  ;;  %491 = vmatprep.mubr.f32.mxu1 %v296_v23 }
 0x10b   :  { %492 = vmatmul.mubr.f32.gmra.mrb[12].mxu1 %v295_v25  ;;  %v297_v31 = vmax.f32 %v231_v26, 0.0 }
 0x10c   :  { %v298_v29 = vmax.f32 %v233_v28, 0.0  ;;  %v236_v30 = vpop.f32.mrb[16].mxu0 }
 0x10d   :  { %v237_v32 = vadd.f32 %v236_v30, %v1298_v45  ;;  %v238_v33 = vpop.f32.mrb[17].mxu0 }
 0x10e   :  { %v239_v34 = vadd.f32 %v238_v33, %v1302_v46  ;;  %497 = vmatprep.mubr.f32.mxu1 %v298_v29 }
 0x10f   :  { %498 = vmatmul.mubr.f32.gmra.mrb[14].mxu1 %v297_v31  ;;  %v299_v37 = vmax.f32 %v237_v32, 0.0 }
 0x110   :  { %v300_v35 = vmax.f32 %v239_v34, 0.0  ;;  %v242_v36 = vpop.f32.mrb[18].mxu0 }
 0x111   :  { %v243_v38 = vadd.f32 %v242_v36, %v1298_v45  ;;  %v244_v39 = vpop.f32.mrb[19].mxu0 }
 0x112   :  { %v245_v40 = vadd.f32 %v244_v39, %v1302_v46  ;;  %503 = vmatprep.mubr.f32.mxu1 %v300_v35 }
 0x113   :  { %504 = vmatmul.mubr.f32.gmra.mrb[16].mxu1 %v299_v37  ;;  %v301_v48 = vmax.f32 %v243_v38, 0.0 }
 0x114   :  { %v302_v43 = vmax.f32 %v245_v40, 0.0  ;;  %v248_v47 = vpop.f32.mrb[20].mxu0 }
 0x115   :  { %v249_v49 = vadd.f32 %v248_v47, %v1298_v45  ;;  %v250_v50 = vpop.f32.mrb[21].mxu0 }
 0x116   :  { %v251_v51 = vadd.f32 %v250_v50, %v1302_v46  ;;  %509 = vmatprep.mubr.f32.mxu1 %v302_v43 }
 0x117   :  { %510 = vmatmul.mubr.f32.gmra.mrb[18].mxu1 %v301_v48  ;;  %v303_v54 = vmax.f32 %v249_v49, 0.0 }
 0x118   :  { %v304_v52 = vmax.f32 %v251_v51, 0.0  ;;  %v254_v53 = vpop.f32.mrb[22].mxu0 }
 0x119   :  { %v255_v55 = vadd.f32 %v254_v53, %v1298_v45  ;;  %v256_v0 = vpop.f32.mrb[23].mxu0 }
 0x11a   :  { %v257_v56 = vadd.f32 %v256_v0, %v1302_v46  ;;  %515 = vmatprep.mubr.f32.mxu1 %v304_v52 }
 0x11b   :  { %516 = vmatmul.mubr.f32.gmra.mrb[20].mxu1 %v303_v54  ;;  %v305_v59 = vmax.f32 %v255_v55, 0.0 }
 0x11c   :  { %v306_v57 = vmax.f32 %v257_v56, 0.0  ;;  %v260_v58 = vpop.f32.mrb[24].mxu0 }
 0x11d   :  { %v261_v60 = vadd.f32 %v260_v58, %v1298_v45  ;;  %v262_v61 = vpop.f32.mrb[25].mxu0 }
 0x11e   :  { %v263_v62 = vadd.f32 %v262_v61, %v1302_v46  ;;  %521 = vmatprep.mubr.f32.mxu1 %v306_v57 }
 0x11f   :  { %522 = vmatmul.mubr.f32.gmra.mrb[22].mxu1 %v305_v59  ;;  %v307_v2 = vmax.f32 %v261_v60, 0.0 }
 0x120   :  { %v308_v63 = vmax.f32 %v263_v62, 0.0  ;;  %v266_v1 = vpop.f32.mrb[26].mxu0 }
 0x121   :  { %v267_v3 = vadd.f32 %v266_v1, %v1298_v45  ;;  %v268_v4 = vpop.f32.mrb[27].mxu0 }
 0x122   :  { %v269_v5 = vadd.f32 %v268_v4, %v1302_v46  ;;  %527 = vmatprep.mubr.f32.mxu1 %v308_v63 }
 0x123   :  { %528 = vmatmul.mubr.f32.gmra.mrb[24].mxu1 %v307_v2  ;;  %v309_v8 = vmax.f32 %v267_v3, 0.0 }
 0x124   :  { %v310_v6 = vmax.f32 %v269_v5, 0.0  ;;  %v272_v7 = vpop.f32.mrb[28].mxu0 }
 0x125   :  { %v273_v9 = vadd.f32 %v272_v7, %v1298_v45  ;;  %v274_v10 = vpop.f32.mrb[29].mxu0 }
 0x126   :  { %v275_v11 = vadd.f32 %v274_v10, %v1302_v46  ;;  %533 = vmatprep.mubr.f32.mxu1 %v310_v6 }
 0x127   :  { %534 = vmatmul.mubr.f32.gmra.mrb[26].mxu1 %v309_v8  ;;  %v311_v14 = vmax.f32 %v273_v9, 0.0 }
 0x128   :  { %v312_v12 = vmax.f32 %v275_v11, 0.0  ;;  %v278_v13 = vpop.f32.mrb[30].mxu0 }
 0x129   :  { %v279_v15 = vadd.f32 %v278_v13, %v1298_v45  ;;  %v280_v16 = vpop.f32.mrb[31].mxu0  ;;  %v1345_v45 = vrot.slane %v379_v20, %v69_v44 }
 0x12a   :  { %v281_v17 = vadd.f32 %v280_v16, %v1302_v46  ;;  %539 = vmatprep.mubr.f32.mxu1 %v312_v12 }
 0x12b   :  { %540 = vmatmul.mubr.f32.gmra.mrb[28].mxu1 %v311_v14  ;;  %v313_v19 = vmax.f32 %v279_v15, 0.0 }
 0x12c   :  { %v314_v18 = vmax.f32 %v281_v17, 0.0 }
 0x12e   :  { %545 = vmatprep.mubr.f32.mxu1 %v314_v18 }
 0x12f   :  { %546 = vmatmul.mubr.f32.gmra.mrb[30].mxu1 %v313_v19 }
 0x1c6   :  { %v457_v22 = vpop.f32.mrb[0].mxu1 }
 0x1c7   :  { %v458_v46 = vadd.f32 %v457_v22, %v1341_v21  ;;  %v459_v23 = vpop.f32.mrb[1].mxu1 }
 0x1c8   :  { %v460_v24 = vadd.f32 %v459_v23, %v1345_v45 }
 0x1c9   :  { %v552_v27 = vmax.f32 %v458_v46, 0.0 }
 0x1ca   :  { %v553_v25 = vmax.f32 %v460_v24, 0.0  ;;  %v463_v26 = vpop.f32.mrb[2].mxu1 }
 0x1cb   :  { %v464_v28 = vadd.f32 %v463_v26, %v1341_v21  ;;  %v465_v29 = vpop.f32.mrb[3].mxu1 }
 0x1cc   :  { %v466_v30 = vadd.f32 %v465_v29, %v1345_v45  ;;  %682 = vmatprep.mubr.f32.mxu0 %v553_v25 }
 0x1cd   :  { %683 = vmatmul.mubr.f32.vlgmr.msra.gmra.mrb[32].mxu0 %v552_v27  ;;  %v554_v44 = vmax.f32 %v464_v28, 0.0 }
 0x1ce   :  { %v555_v42 = vmax.f32 %v466_v30, 0.0  ;;  %v469_v41 = vpop.f32.mrb[4].mxu1 }
 0x1cf   :  { %v470_v31 = vadd.f32 %v469_v41, %v1341_v21  ;;  %v471_v32 = vpop.f32.mrb[5].mxu1 }
 0x1d0   :  { %v472_v33 = vadd.f32 %v471_v32, %v1345_v45  ;;  %687 = vmatprep.mubr.f32.mxu0 %v555_v42 }
 0x1d1   :  { %688 = vmatmul.mubr.f32.gmra.mrb[34].mxu0 %v554_v44  ;;  %v556_v36 = vmax.f32 %v470_v31, 0.0 }
 0x1d2   :  { %v557_v34 = vmax.f32 %v472_v33, 0.0  ;;  %v475_v35 = vpop.f32.mrb[6].mxu1 }
 0x1d3   :  { %v476_v37 = vadd.f32 %v475_v35, %v1341_v21  ;;  %v477_v38 = vpop.f32.mrb[7].mxu1 }
 0x1d4   :  { %v478_v39 = vadd.f32 %v477_v38, %v1345_v45  ;;  %692 = vmatprep.mubr.f32.mxu0 %v557_v34 }
 0x1d5   :  { %693 = vmatmul.mubr.f32.gmra.mrb[36].mxu0 %v556_v36  ;;  %v558_v47 = vmax.f32 %v476_v37, 0.0 }
 0x1d6   :  { %v559_v40 = vmax.f32 %v478_v39, 0.0  ;;  %v481_v43 = vpop.f32.mrb[8].mxu1 }
 0x1d7   :  { %v482_v48 = vadd.f32 %v481_v43, %v1341_v21  ;;  %v483_v49 = vpop.f32.mrb[9].mxu1 }
 0x1d8   :  { %v484_v50 = vadd.f32 %v483_v49, %v1345_v45  ;;  %697 = vmatprep.mubr.f32.mxu0 %v559_v40 }
 0x1d9   :  { %698 = vmatmul.mubr.f32.gmra.mrb[38].mxu0 %v558_v47  ;;  %v560_v53 = vmax.f32 %v482_v48, 0.0 }
 0x1da   :  { %v561_v51 = vmax.f32 %v484_v50, 0.0  ;;  %v487_v52 = vpop.f32.mrb[10].mxu1 }
 0x1db   :  { %v488_v54 = vadd.f32 %v487_v52, %v1341_v21  ;;  %v489_v55 = vpop.f32.mrb[11].mxu1 }
 0x1dc   :  { %v490_v0 = vadd.f32 %v489_v55, %v1345_v45  ;;  %702 = vmatprep.mubr.f32.mxu0 %v561_v51 }
 0x1dd   :  { %703 = vmatmul.mubr.f32.gmra.mrb[40].mxu0 %v560_v53  ;;  %v562_v58 = vmax.f32 %v488_v54, 0.0 }
 0x1de   :  { %v563_v56 = vmax.f32 %v490_v0, 0.0  ;;  %v493_v57 = vpop.f32.mrb[12].mxu1 }
 0x1df   :  { %v494_v59 = vadd.f32 %v493_v57, %v1341_v21  ;;  %v495_v60 = vpop.f32.mrb[13].mxu1  ;;  %v617_v57 = vstv %s1391_s6 }
 0x1e0   :  { %v496_v61 = vadd.f32 %v495_v60, %v1345_v45  ;;  %707 = vmatprep.mubr.f32.mxu0 %v563_v56 }
 0x1e1   :  { %708 = vmatmul.mubr.f32.gmra.mrb[42].mxu0 %v562_v58  ;;  %v564_v1 = vmax.f32 %v494_v59, 0.0 }
 0x1e2   :  { %v565_v62 = vmax.f32 %v496_v61, 0.0  ;;  %v499_v63 = vpop.f32.mrb[14].mxu1 }
 0x1e3   :  { %v500_v2 = vadd.f32 %v499_v63, %v1341_v21  ;;  %v501_v3 = vpop.f32.mrb[15].mxu1 }
 0x1e4   :  { %v502_v4 = vadd.f32 %v501_v3, %v1345_v45  ;;  %712 = vmatprep.mubr.f32.mxu0 %v565_v62 }
 0x1e5   :  { %713 = vmatmul.mubr.f32.gmra.mrb[44].mxu0 %v564_v1  ;;  %v566_v7 = vmax.f32 %v500_v2, 0.0 }
 0x1e6   :  { %v567_v5 = vmax.f32 %v502_v4, 0.0  ;;  %v505_v6 = vpop.f32.mrb[16].mxu1 }
 0x1e7   :  { %v506_v8 = vadd.f32 %v505_v6, %v1341_v21  ;;  %v507_v9 = vpop.f32.mrb[17].mxu1 }
 0x1e8   :  { %v508_v10 = vadd.f32 %v507_v9, %v1345_v45  ;;  %717 = vmatprep.mubr.f32.mxu0 %v567_v5 }
 0x1e9   :  { %718 = vmatmul.mubr.f32.gmra.mrb[46].mxu0 %v566_v7  ;;  %v568_v13 = vmax.f32 %v506_v8, 0.0 }
 0x1ea   :  { %v569_v11 = vmax.f32 %v508_v10, 0.0  ;;  %v511_v12 = vpop.f32.mrb[18].mxu1 }
 0x1eb   :  { %v512_v14 = vadd.f32 %v511_v12, %v1341_v21  ;;  %v513_v15 = vpop.f32.mrb[19].mxu1 }
 0x1ec   :  { %v514_v16 = vadd.f32 %v513_v15, %v1345_v45  ;;  %722 = vmatprep.mubr.f32.mxu0 %v569_v11 }
 0x1ed   :  { %723 = vmatmul.mubr.f32.gmra.mrb[48].mxu0 %v568_v13  ;;  %v570_v19 = vmax.f32 %v512_v14, 0.0 }
 0x1ee   :  { %v571_v17 = vmax.f32 %v514_v16, 0.0  ;;  %v517_v18 = vpop.f32.mrb[20].mxu1 }
 0x1ef   :  { %v518_v20 = vadd.f32 %v517_v18, %v1341_v21  ;;  %v519_v22 = vpop.f32.mrb[21].mxu1 }
 0x1f0   :  { %v520_v46 = vadd.f32 %v519_v22, %v1345_v45  ;;  %727 = vmatprep.mubr.f32.mxu0 %v571_v17 }
 0x1f1   :  { %728 = vmatmul.mubr.f32.gmra.mrb[50].mxu0 %v570_v19  ;;  %v572_v25 = vmax.f32 %v518_v20, 0.0 }
 0x1f2   :  { %v573_v23 = vmax.f32 %v520_v46, 0.0  ;;  %v523_v24 = vpop.f32.mrb[22].mxu1 }
 0x1f3   :  { %v524_v26 = vadd.f32 %v523_v24, %v1341_v21  ;;  %v525_v27 = vpop.f32.mrb[23].mxu1 }
 0x1f4   :  { %v526_v28 = vadd.f32 %v525_v27, %v1345_v45  ;;  %732 = vmatprep.mubr.f32.mxu0 %v573_v23 }
 0x1f5   :  { %733 = vmatmul.mubr.f32.gmra.mrb[52].mxu0 %v572_v25  ;;  %v574_v42 = vmax.f32 %v524_v26, 0.0 }
 0x1f6   :  { %v575_v29 = vmax.f32 %v526_v28, 0.0  ;;  %v529_v30 = vpop.f32.mrb[24].mxu1 }
 0x1f7   :  { %v530_v41 = vadd.f32 %v529_v30, %v1341_v21  ;;  %v531_v44 = vpop.f32.mrb[25].mxu1 }
 0x1f8   :  { %v532_v31 = vadd.f32 %v531_v44, %v1345_v45  ;;  %737 = vmatprep.mubr.f32.mxu0 %v575_v29 }
 0x1f9   :  { %738 = vmatmul.mubr.f32.gmra.mrb[54].mxu0 %v574_v42  ;;  %v576_v34 = vmax.f32 %v530_v41, 0.0 }
 0x1fa   :  { %v577_v32 = vmax.f32 %v532_v31, 0.0  ;;  %v535_v33 = vpop.f32.mrb[26].mxu1 }
 0x1fb   :  { %v536_v35 = vadd.f32 %v535_v33, %v1341_v21  ;;  %v537_v36 = vpop.f32.mrb[27].mxu1 }
 0x1fc   :  { %v538_v37 = vadd.f32 %v537_v36, %v1345_v45  ;;  %742 = vmatprep.mubr.f32.mxu0 %v577_v32 }
 0x1fd   :  { %743 = vmatmul.mubr.f32.gmra.mrb[56].mxu0 %v576_v34  ;;  %v578_v40 = vmax.f32 %v536_v35, 0.0 }
 0x1fe   :  { %v579_v38 = vmax.f32 %v538_v37, 0.0  ;;  %v541_v39 = vpop.f32.mrb[28].mxu1 }
 0x1ff   :  { %v542_v43 = vadd.f32 %v541_v39, %v1341_v21  ;;  %v543_v47 = vpop.f32.mrb[29].mxu1 }
 0x200   :  { %v544_v48 = vadd.f32 %v543_v47, %v1345_v45  ;;  %747 = vmatprep.mubr.f32.mxu0 %v579_v38 }
 0x201   :  { %748 = vmatmul.mubr.f32.gmra.mrb[58].mxu0 %v578_v40  ;;  %v580_v51 = vmax.f32 %v542_v43, 0.0 }
 0x202   :  { %v581_v49 = vmax.f32 %v544_v48, 0.0  ;;  %v547_v50 = vpop.f32.mrb[30].mxu1 }
 0x203   :  { %v548_v52 = vadd.f32 %v547_v50, %v1341_v21  ;;  %v549_v53 = vpop.f32.mrb[31].mxu1 }
 0x204   :  { %v550_v54 = vadd.f32 %v549_v53, %v1345_v45  ;;  %752 = vmatprep.mubr.f32.mxu0 %v581_v49 }
 0x205   :  { %753 = vmatmul.mubr.f32.gmra.mrb[60].mxu0 %v580_v51  ;;  %v582_v0 = vmax.f32 %v548_v52, 0.0 }
 0x206   :  { %v583_v55 = vmax.f32 %v550_v54, 0.0 }
 0x208   :  { %757 = vmatprep.mubr.f32.mxu0 %v583_v55 }
 0x209   :  { %758 = vmatmul.mubr.f32.gmra.mrb[62].mxu0 %v582_v0 }
 0x2a0   :  { %v869_v56 = vpop.f32.mrb[32].mxu0 }
 0x2a1   :  { %v870_v58 = vpop.f32.mrb[33].mxu0 }
 0x2a2   :  { %v871_v59 = vadd.f32 %v870_v58, %v869_v56 }
 0x2a4   :  { %v685_v60 = vadd.f32 %v871_v59, %v617_v57  ;;  %v872_v61 = vpop.f32.mrb[34].mxu0 }
 0x2a5   :  { %v873_v21 = vpop.f32.mrb[35].mxu0 }
 0x2a6   :  { %764 = vst.msk [vmem:[#allocation5] sm:$0xff] %vm763_vm1, %v685_v60 }
 0x2a8   :  { %v875_v62 = vpop.f32.mrb[36].mxu0 }
 0x2a9   :  { %v876_v45 = vpop.f32.mrb[37].mxu0 }
 0x2ac   :  { %v878_v63 = vpop.f32.mrb[38].mxu0 }
 0x2ad   :  { %v809_v1 = vld [vmem:[#allocation5] sm:$0xff]  ;;  %v879_v2 = vpop.f32.mrb[39].mxu0 }
 0x2ae   :  { %810 = vst [vmem:[%s1392_s7] sm:$0xff] %v809_v1 }
 0x2b0   :  { %v881_v3 = vpop.f32.mrb[40].mxu0 }
 0x2b1   :  { %v882_v4 = vpop.f32.mrb[41].mxu0 }
 0x2b4   :  { %v884_v5 = vpop.f32.mrb[42].mxu0 }
 0x2b5   :  { %v885_v6 = vpop.f32.mrb[43].mxu0 }
 0x2b8   :  { %v887_v7 = vpop.f32.mrb[44].mxu0 }
 0x2b9   :  { %v888_v8 = vpop.f32.mrb[45].mxu0 }
 0x2bc   :  { %v890_v9 = vpop.f32.mrb[46].mxu0 }
 0x2bd   :  { %v891_v10 = vpop.f32.mrb[47].mxu0 }
 0x2c0   :  { %v893_v11 = vpop.f32.mrb[48].mxu0 }
 0x2c1   :  { %v894_v12 = vpop.f32.mrb[49].mxu0 }
 0x2c4   :  { %v896_v13 = vpop.f32.mrb[50].mxu0 }
 0x2c5   :  { %v897_v14 = vpop.f32.mrb[51].mxu0 }
 0x2c8   :  { %v899_v15 = vpop.f32.mrb[52].mxu0 }
 0x2c9   :  { %v900_v16 = vpop.f32.mrb[53].mxu0 }
 0x2cc   :  { %v902_v17 = vpop.f32.mrb[54].mxu0 }
 0x2cd   :  { %v903_v18 = vpop.f32.mrb[55].mxu0 }
 0x2d0   :  { %v905_v19 = vpop.f32.mrb[56].mxu0 }
 0x2d1   :  { %v906_v20 = vpop.f32.mrb[57].mxu0 }
 0x2d4   :  { %v908_v22 = vpop.f32.mrb[58].mxu0 }
 0x2d5   :  { %v909_v46 = vpop.f32.mrb[59].mxu0 }
 0x2d8   :  { %v911_v23 = vpop.f32.mrb[60].mxu0 }
 0x2d9   :  { %v912_v24 = vpop.f32.mrb[61].mxu0 }
 0x2dc   :  { %v914_v25 = vpop.f32.mrb[62].mxu0 }
 0x2dd   :  { %v915_v26 = vpop.f32.mrb[63].mxu0 }
 0x2de   :  { %816 = vsyncpa [#allocation4], 1 }

</bundles_post_ra>
